<compile_context>
chip_gen: v6e
topology: v6e:2x2x1
jax: 0.10.0
libtpu: 0.0.40
codegen_flags: <defaults>
</compile_context>

<pallas_src>
import jax
import jax.numpy as jnp
from jax import lax
from jax.experimental import pallas as pl
from jax.experimental.pallas import tpu as pltpu

_OUT_ROWS = 16  # bf16 native sublane tile; row 0 of the output is the real logit row


def _mlp_kernel(x_ref, w1_ref, b1_ref, w2_ref, b2_ref, w3t_ref, b3_ref, o_ref):
    # Layer 1: Linear (bf16 operands, f32 accumulation) + bias + ReLU -> bf16.
    x = x_ref[...].astype(jnp.bfloat16)
    h1 = jnp.dot(x, w1_ref[...], preferred_element_type=jnp.float32)
    h1 = jnp.maximum(h1 + b1_ref[...], 0.0).astype(jnp.bfloat16)
    # Layer 2: Linear + bias + ReLU -> bf16.
    h2 = jnp.dot(h1, w2_ref[...], preferred_element_type=jnp.float32)
    h2 = jnp.maximum(h2 + b2_ref[...], 0.0).astype(jnp.bfloat16)
    # Layer 3: (16, H) x (bm, H) contracted on H -> (16, bm).  Batch lands on
    # the lane axis, so the store is lane-dense (no 128-wide padded writeback).
    logits = lax.dot_general(w3t_ref[...], h2, (((1,), (1,)), ((), ())),
                             preferred_element_type=jnp.float32)
    logits = logits + b3_ref[...]
    o_ref[...] = jax.nn.sigmoid(logits).astype(o_ref.dtype)


def _round_up(x, m):
    return ((x + m - 1) // m) * m


def _pad2d(a, rows, cols):
    r, c = a.shape
    return jnp.pad(a, ((0, rows - r), (0, cols - c)))


def outfit_compatibility_gnn(x, w1, b1, w2, b2, w3, b3, *, block_m=512):
    """Fused forward of OutfitCompatibilityGNN.

    x : (N, input_dim) float32
    w1: (input_dim, hidden), b1: (1, hidden)
    w2: (hidden, hidden),   b2: (1, hidden)
    w3: (hidden, 1),        b3: (1, 1)
    returns: (N, 1) float32 in (0, 1)
    """
    n, d_in = x.shape
    hidden = w1.shape[1]

    # Hidden padded to the MXU-native width (256 on v6e/v7x; 128 for tiny hidden).
    # Zero padding is exact: relu(0 + 0) = 0 propagates and zero W3 columns add 0.
    h_pad = _round_up(hidden, 256) if hidden > 128 else 128

    # Batch tile.  For small batches use the exact extent (no masking at all);
    # otherwise a large 128-aligned tile, capped so the grid keeps >= 8 steps.
    if n < 128:
        bm = n
    else:
        bm = max(128, min(_round_up(block_m, 128), _round_up(n, 128)))
        while bm > 128 and (n + bm - 1) // bm < 8:
            bm -= 128
    grid = ((n + bm - 1) // bm,)

    # Weights / biases: pad + cast once (tiny).  x goes in untouched (f32).
    w1_p = _pad2d(w1, d_in, h_pad).astype(jnp.bfloat16)
    b1_p = _pad2d(b1, 1, h_pad).astype(jnp.float32)
    w2_p = _pad2d(w2, h_pad, h_pad).astype(jnp.bfloat16)
    b2_p = _pad2d(b2, 1, h_pad).astype(jnp.float32)
    w3t_p = _pad2d(w3.reshape(1, hidden), _OUT_ROWS, h_pad).astype(jnp.bfloat16)
    b3_p = b3.reshape(1, 1).astype(jnp.float32)

    # Explicit VMEM budget: resident weights (single-buffered) + pipelined x/out
    # double buffers + intermediates, with generous headroom.
    resident = ((w1_p.size + w2_p.size + w3t_p.size) * 2
                + (b1_p.size + b2_p.size + b3_p.size) * 4)
    pipelined = 2 * (bm * d_in * 4) + 2 * (_OUT_ROWS * bm * 4)
    working = bm * d_in * 2 + 2 * bm * h_pad * (4 + 2)
    vmem_limit = int(min(max(2 * (resident + pipelined + working) + (8 << 20),
                             32 << 20), 128 << 20))

    flops = 2 * n * (d_in * h_pad + h_pad * h_pad + h_pad * _OUT_ROWS)
    bytes_accessed = int(x.size * 4 + resident + _OUT_ROWS * n * 4)
    cost = pl.CostEstimate(flops=flops,
                           transcendentals=_OUT_ROWS * n,
                           bytes_accessed=bytes_accessed)

    out = pl.pallas_call(
        _mlp_kernel,
        out_shape=jax.ShapeDtypeStruct((_OUT_ROWS, n), jnp.float32),
        grid=grid,
        in_specs=[
            pl.BlockSpec((bm, d_in), lambda i: (i, 0)),              # x (pipelined)
            pl.BlockSpec(memory_space=pltpu.MemorySpace.VMEM),       # w1 (resident)
            pl.BlockSpec(memory_space=pltpu.MemorySpace.VMEM),       # b1
            pl.BlockSpec(memory_space=pltpu.MemorySpace.VMEM),       # w2 (resident)
            pl.BlockSpec(memory_space=pltpu.MemorySpace.VMEM),       # b2
            pl.BlockSpec(memory_space=pltpu.MemorySpace.VMEM),       # w3^T (resident)
            pl.BlockSpec(memory_space=pltpu.MemorySpace.VMEM),       # b3
        ],
        out_specs=pl.BlockSpec((_OUT_ROWS, bm), lambda i: (0, i)),
        compiler_params=pltpu.CompilerParams(
            dimension_semantics=("parallel",),
            vmem_limit_bytes=vmem_limit,
        ),
        cost_estimate=cost,
    )(x, w1_p, b1_p, w2_p, b2_p, w3t_p, b3_p)

    # Row 0 holds the real logits for every batch element; reshape to (N, 1).
    return out[0].reshape(n, 1)


def init_params(key, input_dim, hidden_dim):
    """Deterministic synthetic init mirroring nn.Linear shapes (transposed to (in, out))."""
    k1, k2, k3, k4, k5, k6 = jax.random.split(key, 6)
    w1 = jax.random.normal(k1, (input_dim, hidden_dim), jnp.float32) * 0.05
    b1 = jax.random.normal(k2, (1, hidden_dim), jnp.float32) * 0.01
    w2 = jax.random.normal(k3, (hidden_dim, hidden_dim), jnp.float32) * 0.05
    b2 = jax.random.normal(k4, (1, hidden_dim), jnp.float32) * 0.01
    w3 = jax.random.normal(k5, (hidden_dim, 1), jnp.float32) * 0.05
    b3 = jax.random.normal(k6, (1, 1), jnp.float32) * 0.01
    return w1, b1, w2, b2, w3, b3


def reference_forward(x, w1, b1, w2, b2, w3, b3):
    # Matches the kernel's numerics: bf16 matmul inputs, f32 accumulate/elementwise.
    bf = jnp.bfloat16
    h = jax.nn.relu(jnp.dot(x.astype(bf), w1.astype(bf),
                            preferred_element_type=jnp.float32) + b1)
    h = jax.nn.relu(jnp.dot(h.astype(bf), w2.astype(bf),
                            preferred_element_type=jnp.float32) + b2)
    logit = jnp.dot(h.astype(bf), w3.astype(bf),
                    preferred_element_type=jnp.float32) + b3
    return jax.nn.sigmoid(logit)


if __name__ == "__main__":
    key = jax.random.PRNGKey(0)
    kx, kp = jax.random.split(key)

    batch = 16          # number of outfit feature vectors
    input_dim = 64      # item-feature embedding size
    hidden_dim = 32     # hidden_dim (small synthetic test; padded to 128 internally)

    x = jax.random.normal(kx, (batch, input_dim), jnp.float32)
    params = init_params(kp, input_dim, hidden_dim)

    out = outfit_compatibility_gnn(x, *params)
    out = jax.block_until_ready(out)

    ref = reference_forward(x, *params)
    assert out.shape == (batch, 1), out.shape
    assert bool(jnp.all(jnp.isfinite(out))), "non-finite output"
    # bf16 matmul numerics: expect ~1e-3 agreement with an f32 reference.
    assert jnp.allclose(out, ref, atol=2e-3, rtol=2e-3), "mismatch vs reference"

    print("KERNEL_OK")
</pallas_src>

<mosaic_0001>
module attributes {stable_mosaic.version = 11 : i64} {
  func.func @_mlp_kernel(%arg0: i32, %arg1: memref<16x64xf32, #tpu.memory_space<vmem>>, %arg2: memref<64x128xbf16, #tpu.memory_space<vmem>>, %arg3: memref<1x128xf32, #tpu.memory_space<vmem>>, %arg4: memref<128x128xbf16, #tpu.memory_space<vmem>>, %arg5: memref<1x128xf32, #tpu.memory_space<vmem>>, %arg6: memref<16x128xbf16, #tpu.memory_space<vmem>>, %arg7: memref<1x1xf32, #tpu.memory_space<vmem>>, %arg8: memref<16x16xf32, #tpu.memory_space<vmem>>) attributes {dimension_semantics = [#tpu.dimension_semantics<parallel>], iteration_bounds = array<i64: 1>, scalar_prefetch = 0 : i64, scratch_operands = 0 : i64, tpu.core_type = #tpu.core_type<tc>, window_params = [{transform_indices = @transform_0, window_bounds = array<i64: 16, 64>}, {pipeline_mode = #tpu.pipeline_mode<synchronous>, transform_indices = @transform_1, window_bounds = array<i64: 64, 128>}, {pipeline_mode = #tpu.pipeline_mode<synchronous>, transform_indices = @transform_2, window_bounds = array<i64: 1, 128>}, {pipeline_mode = #tpu.pipeline_mode<synchronous>, transform_indices = @transform_3, window_bounds = array<i64: 128, 128>}, {pipeline_mode = #tpu.pipeline_mode<synchronous>, transform_indices = @transform_4, window_bounds = array<i64: 1, 128>}, {pipeline_mode = #tpu.pipeline_mode<synchronous>, transform_indices = @transform_5, window_bounds = array<i64: 16, 128>}, {pipeline_mode = #tpu.pipeline_mode<synchronous>, transform_indices = @transform_6, window_bounds = array<i64: 1, 1>}, {transform_indices = @transform_7, window_bounds = array<i64: 16, 16>}]} {
    %c0 = arith.constant 0 : index
    %c0_0 = arith.constant 0 : index
    %0 = vector.load %arg1[%c0, %c0_0] : memref<16x64xf32, #tpu.memory_space<vmem>>, vector<16x64xf32>
    %1 = arith.truncf %0 : vector<16x64xf32> to vector<16x64xbf16>
    %c0_1 = arith.constant 0 : index
    %c0_2 = arith.constant 0 : index
    %2 = vector.load %arg2[%c0_1, %c0_2] : memref<64x128xbf16, #tpu.memory_space<vmem>>, vector<64x128xbf16>
    %cst = arith.constant dense<0.000000e+00> : vector<16x128xf32>
    %3 = tpu.matmul %1, %2, %cst {dimension_numbers = #tpu.dot_dimension_numbers<[1], [0], [0], [1], [0, 0, 1, 1], [], []>} : vector<16x64xbf16>, vector<64x128xbf16>, vector<16x128xf32> -> vector<16x128xf32>
    %c0_3 = arith.constant 0 : index
    %c0_4 = arith.constant 0 : index
    %4 = vector.load %arg3[%c0_3, %c0_4] : memref<1x128xf32, #tpu.memory_space<vmem>>, vector<1x128xf32>
    %5 = vector.broadcast %4 : vector<1x128xf32> to vector<16x128xf32>
    %6 = arith.addf %3, %5 : vector<16x128xf32>
    %cst_5 = arith.constant 0.000000e+00 : f32
    %7 = vector.broadcast %cst_5 : f32 to vector<16x128xf32>
    %8 = arith.maximumf %6, %7 : vector<16x128xf32>
    %9 = arith.truncf %8 : vector<16x128xf32> to vector<16x128xbf16>
    %c0_6 = arith.constant 0 : index
    %c0_7 = arith.constant 0 : index
    %10 = vector.load %arg4[%c0_6, %c0_7] : memref<128x128xbf16, #tpu.memory_space<vmem>>, vector<128x128xbf16>
    %cst_8 = arith.constant dense<0.000000e+00> : vector<16x128xf32>
    %11 = tpu.matmul %9, %10, %cst_8 {dimension_numbers = #tpu.dot_dimension_numbers<[1], [0], [0], [1], [0, 0, 1, 1], [], []>} : vector<16x128xbf16>, vector<128x128xbf16>, vector<16x128xf32> -> vector<16x128xf32>
    %c0_9 = arith.constant 0 : index
    %c0_10 = arith.constant 0 : index
    %12 = vector.load %arg5[%c0_9, %c0_10] : memref<1x128xf32, #tpu.memory_space<vmem>>, vector<1x128xf32>
    %13 = vector.broadcast %12 : vector<1x128xf32> to vector<16x128xf32>
    %14 = arith.addf %11, %13 : vector<16x128xf32>
    %cst_11 = arith.constant 0.000000e+00 : f32
    %15 = vector.broadcast %cst_11 : f32 to vector<16x128xf32>
    %16 = arith.maximumf %14, %15 : vector<16x128xf32>
    %17 = arith.truncf %16 : vector<16x128xf32> to vector<16x128xbf16>
    %c0_12 = arith.constant 0 : index
    %c0_13 = arith.constant 0 : index
    %18 = vector.load %arg6[%c0_12, %c0_13] : memref<16x128xbf16, #tpu.memory_space<vmem>>, vector<16x128xbf16>
    %cst_14 = arith.constant dense<0.000000e+00> : vector<16x16xf32>
    %19 = tpu.matmul %18, %17, %cst_14 {dimension_numbers = #tpu.dot_dimension_numbers<[1], [1], [0], [0], [0, 0, 1, 0], [], []>} : vector<16x128xbf16>, vector<16x128xbf16>, vector<16x16xf32> -> vector<16x16xf32>
    %c0_15 = arith.constant 0 : index
    %c0_16 = arith.constant 0 : index
    %20 = vector.load %arg7[%c0_15, %c0_16] : memref<1x1xf32, #tpu.memory_space<vmem>>, vector<1x1xf32>
    %21 = vector.broadcast %20 : vector<1x1xf32> to vector<16x16xf32>
    %22 = arith.addf %19, %21 : vector<16x16xf32>
    %23 = arith.negf %22 : vector<16x16xf32>
    %24 = math.exp %23 : vector<16x16xf32>
    %cst_17 = arith.constant 1.000000e+00 : f32
    %25 = vector.broadcast %cst_17 : f32 to vector<16x16xf32>
    %26 = arith.addf %25, %24 : vector<16x16xf32>
    %27 = arith.divf %25, %26 : vector<16x16xf32>
    %c0_18 = arith.constant 0 : index
    %c0_19 = arith.constant 0 : index
    %28 = vector.load %arg8[%c0_18, %c0_19] : memref<16x16xf32, #tpu.memory_space<vmem>>, vector<16x16xf32>
    tpu.vector_store %arg8[%c0_18, %c0_19], %27 {strides = array<i32>} : memref<16x16xf32, #tpu.memory_space<vmem>>, vector<16x16xf32>,
    return
  }
  func.func @transform_0(%arg0: i32) -> (i32, i32) {
    %c0_i32 = arith.constant 0 : i32
    %c0_i32_0 = arith.constant 0 : i32
    return %arg0, %c0_i32 : i32, i32
  }
  func.func @transform_1(%arg0: i32) -> (i32, i32) {
    %c0_i32 = arith.constant 0 : i32
    %c0_i32_0 = arith.constant 0 : i32
    %c0_i32_1 = arith.constant 0 : i32
    return %c0_i32, %c0_i32_0 : i32, i32
  }
  func.func @transform_2(%arg0: i32) -> (i32, i32) {
    %c0_i32 = arith.constant 0 : i32
    %c0_i32_0 = arith.constant 0 : i32
    %c0_i32_1 = arith.constant 0 : i32
    return %c0_i32, %c0_i32_0 : i32, i32
  }
  func.func @transform_3(%arg0: i32) -> (i32, i32) {
    %c0_i32 = arith.constant 0 : i32
    %c0_i32_0 = arith.constant 0 : i32
    %c0_i32_1 = arith.constant 0 : i32
    return %c0_i32, %c0_i32_0 : i32, i32
  }
  func.func @transform_4(%arg0: i32) -> (i32, i32) {
    %c0_i32 = arith.constant 0 : i32
    %c0_i32_0 = arith.constant 0 : i32
    %c0_i32_1 = arith.constant 0 : i32
    return %c0_i32, %c0_i32_0 : i32, i32
  }
  func.func @transform_5(%arg0: i32) -> (i32, i32) {
    %c0_i32 = arith.constant 0 : i32
    %c0_i32_0 = arith.constant 0 : i32
    %c0_i32_1 = arith.constant 0 : i32
    return %c0_i32, %c0_i32_0 : i32, i32
  }
  func.func @transform_6(%arg0: i32) -> (i32, i32) {
    %c0_i32 = arith.constant 0 : i32
    %c0_i32_0 = arith.constant 0 : i32
    %c0_i32_1 = arith.constant 0 : i32
    return %c0_i32, %c0_i32_0 : i32, i32
  }
  func.func @transform_7(%arg0: i32) -> (i32, i32) {
    %c0_i32 = arith.constant 0 : i32
    %c0_i32_0 = arith.constant 0 : i32
    return %c0_i32, %arg0 : i32, i32
  }
}

</mosaic_0001>

<bundles_post_ra>
// kernel: tpu_custom_call.1
= control target key start
LH: loop header
LB: loop body
LE: loop exit
PB: predicated region body
PF: predicated region fallthrough
CT: control target
= control target key end

     0   :  { %s644_s0 = inlined_call_operand.hbm [shape: f32[16,64], index: 0, kind: input, shape index: {}]   ;;  %s645_s1 = inlined_call_operand.hbm [shape: bf16[64,128], index: 1, kind: input, shape index: {}]   ;;  %s646_s2 = inlined_call_operand.vmem [shape: f32[1,128], index: 2, kind: input, shape index: {}]   ;;  %s647_s3 = inlined_call_operand.hbm [shape: bf16[128,128], index: 3, kind: input, shape index: {}]   ;;  %s648_s4 = inlined_call_operand.vmem [shape: f32[1,128], index: 4, kind: input, shape index: {}]   ;;  %s649_s5 = inlined_call_operand.vmem [shape: bf16[16,128], index: 5, kind: input, shape index: {}]   ;;  %s650_s6 = inlined_call_operand.<no memory space> [shape: f32[1,1], index: 6, kind: input, shape index: {}]   ;;  %s651_s7 = inlined_call_operand.hbm [shape: f32[16,16], index: 7, kind: output, shape index: {}]  }
   0x1   :  { %v12_v0 = vstv %s650_s6 }
   0x2   :  { %13 = vst [vmem:[#allocation2] sm:$0x1] %v12_v0 }
   0x3   :  { %14 = vsyncpa [#allocation4], 0 }
   0x4   :  { %15 = vsyncpa [#allocation7], 0 }
   0x5   :  { %16 = vsyncpa [#allocation5], 0  ;;  %s560_s26 = smov [#allocation6]  }
   0x6   :  { %s34_s27 = sshll.u32 %s560_s26, 4  ;;  %s35_s27 = int_to_ptr.vmem [resolvable:$true] %s34_s27 }
   0x7   :  { %s482_s28 = scalar_lea.vmem %s35_s27, 512  ;;  %p487_p1 = scmp.lt.s32.totalorder %s35_s27, %s35_s27 }
   0x8   :  { %p483_p0 = scmp.ne.s32.totalorder %s35_s27, %s482_s28  ;;  %p488_p2 = scmp.lt.s32.totalorder %s482_s28, %s482_s28 }
   0xa   :  { %p489_p3 = por %p488_p2, %p487_p1 }
   0xc   :  { %p490_p4 = pnand %p489_p3, %p483_p0 }
   0xe   :  { %493 = shalt.err (!%p490_p4)
}
   0xf   :  { %s561_s29 = smov 64   ;;  %s562_s30 = smov 4  }
  0x10   :  { %40 = dma.hbm_to_vmem [thread:$0]  %s645_s1, 512, %s35_s27, [#allocation7], %s561_s29, %s561_s29, %s562_s30  }
  0x11   :  { %s563_s6 = smov [#allocation3]  }
  0x12   :  { %s22_s10 = sshll.u32 %s563_s6, 4  ;;  %s23_s10 = int_to_ptr.vmem [resolvable:$true] %s22_s10 }
  0x13   :  { %s502_s11 = scalar_lea.vmem %s23_s10, 256  ;;  %p507_p6 = scmp.lt.s32.totalorder %s23_s10, %s23_s10 }
  0x14   :  { %p503_p5 = scmp.ne.s32.totalorder %s23_s10, %s502_s11  ;;  %p508_p7 = scmp.lt.s32.totalorder %s502_s11, %s502_s11 }
  0x16   :  { %p509_p8 = por %p508_p7, %p507_p6 }
  0x18   :  { %p510_p9 = pnand %p509_p8, %p503_p5 }
  0x1a   :  { %513 = shalt.err (!%p510_p9)
}
  0x1b   :  { %s564_s12 = smov 128   ;;  %s565_s13 = smov 8  }
  0x1c   :  { %28 = dma.hbm_to_vmem [thread:$0]  %s644_s0, 256, %s23_s10, [#allocation4], %s564_s12, %s564_s12, %s565_s13  }
  0x1d   :  { %s566_s1 = smov [#allocation8]  }
  0x1e   :  { %s48_s16 = sshll.u32 %s566_s1, 4  ;;  %s49_s16 = int_to_ptr.vmem [resolvable:$true] %s48_s16 }
  0x1f   :  { %s522_s17 = scalar_lea.vmem %s49_s16, 1024  ;;  %p527_p11 = scmp.lt.s32.totalorder %s49_s16, %s49_s16 }
  0x20   :  { %p523_p10 = scmp.ne.s32.totalorder %s49_s16, %s522_s17  ;;  %p528_p12 = scmp.lt.s32.totalorder %s522_s17, %s522_s17 }
  0x22   :  { %p529_p13 = por %p528_p12, %p527_p11 }
  0x24   :  { %p530_p0 = pnand %p529_p13, %p523_p10 }
  0x26   :  { %533 = shalt.err (!%p530_p0)
}
  0x27   :  { %54 = dma.hbm_to_vmem [thread:$0]  %s647_s3, 1024, %s49_s16, [#allocation7], %s561_s29, %s561_s29, %s562_s30  }
  0x28   :  { %554 = dma.done.wait [#allocation4], 256  }
  0x29   :  { %555 = vsyncadd [#allocation4], 4294967040 }
  0x2a   :  { %556 = dma.done.wait [#allocation7], 1536  }
  0x2b   :  { %557 = vsyncadd [#allocation7], 4294965760  ;;  %v567_v1 = vmov 0.0   ;;  %vm568_vm0 = vmmov 0   ;;  %v453_v2 = vld [vmem:[#allocation6 + $0x18] sm:$0xff]   ;;  %v454_v3 = vld [vmem:[#allocation6 + $0x10] sm:$0xff]  }
  0x2c   :  { %403 = vmatprep.subr.bf16.mxu0 %v567_v1  ;;  %411 = vmatprep.mubr.msk.bf16.mxu0 %vm568_vm0, %v567_v1  ;;  %v457_v4 = vld [vmem:[#allocation8 + $0x38] sm:$0xff]   ;;  %v455_v5 = vld [vmem:[#allocation6 + $0x8] sm:$0xff]   ;;  %v458_v6 = vld [vmem:[#allocation8 + $0x30] sm:$0xff]   ;;  %vm113_vm1 = vcmask 523264   ;;  %v569_v28 = vmov 0   ;;  %vm347_vm2 = vcmask 130048  }
  0x2d   :  { %415 = vmatprep.subr.bf16.mxu1 %v567_v1  ;;  %431 = vmatprep.mubr.msk.bf16.mxu1 %vm568_vm0, %v567_v1  ;;  %v456_v7 = vld [vmem:[#allocation6] sm:$0xff]   ;;  %v71_v8 = vld [vmem:[#allocation3] sm:$0xff]  ;;  %v72_v9 = vld [vmem:[#allocation3 + $0x8] sm:$0xff] }
  0x2e   :  { %404 = vmatpush3.bf16.msra.mxu0 %v453_v2  ;;  %416 = vmatpush3.bf16.msra.mxu1 %v457_v4  ;;  %v459_v10 = vld [vmem:[#allocation8 + $0x28] sm:$0xff]   ;;  %v73_v11 = vpack.c.bf16 %v72_v9, %v71_v8  ;;  %v460_v12 = vld [vmem:[#allocation8 + $0x20] sm:$0xff]   ;;  %v461_v13 = vld [vmem:[#allocation8 + $0x18] sm:$0xff]  }
  0x2f   :  { %405 = vmatprep.subr.bf16.mxu0 %v567_v1  ;;  %417 = vmatprep.subr.bf16.mxu1 %v567_v1  ;;  %v462_v14 = vld [vmem:[#allocation8 + $0x10] sm:$0xff]   ;;  %v463_v15 = vld [vmem:[#allocation8 + $0x8] sm:$0xff]   ;;  %v464_v16 = vld [vmem:[#allocation8] sm:$0xff]  }
  0x30   :  { %v368_v17 = vld [vmem:[%s646_s2] ss:$0 sm:$0xff]  ;;  %452 = vset.pattern.permute.xlu0 %v569_v28 }
  0x31   :  { %v383_v27 = vld [vmem:[#allocation2] ss:$0 sm:$0xff] }
  0x32   :  { %406 = vmatpush3.bf16.msra.mxu0 %v454_v3  ;;  %418 = vmatpush3.bf16.msra.mxu1 %v458_v6  ;;  %v374_v29 = vld [vmem:[%s648_s4] ss:$0 sm:$0xff]  ;;  %s570_s4 = smov [#allocation9]  }
  0x33   :  { %407 = vmatprep.subr.bf16.mxu0 %v567_v1  ;;  %419 = vmatprep.subr.bf16.mxu1 %v567_v1  ;;  %v465_v39 = vld [vmem:[%s649_s5] sm:$0xff]   ;;  %s355_s5 = sshll.u32 %s570_s4, 4  ;;  %s356_s5 = int_to_ptr.vmem [resolvable:$true] %s355_s5 }
  0x34   :  { %285 = vperm.xlu0 %452, %v383_v27   ;;  %s534_s23 = scalar_lea.vmem %s356_s5, 256  ;;  %p539_p2 = scmp.lt.s32.totalorder %s356_s5, %s356_s5 }
  0x35   :  { %p535_p1 = scmp.ne.s32.totalorder %s356_s5, %s534_s23  ;;  %p540_p3 = scmp.lt.s32.totalorder %s534_s23, %s534_s23 }
  0x36   :  { %408 = vmatpush3.bf16.msra.mxu0 %v455_v5  ;;  %420 = vmatpush3.bf16.msra.mxu1 %v459_v10 }
  0x37   :  { %409 = vmatprep.subr.bf16.mxu0 %v567_v1  ;;  %421 = vmatprep.subr.bf16.mxu1 %v567_v1  ;;  %p541_p4 = por %p540_p3, %p539_p2 }
  0x39   :  { %p542_p5 = pnand %p541_p4, %p535_p1 }
  0x3a   :  { %410 = vmatpush3.bf16.msra.mxu0 %v456_v7  ;;  %422 = vmatpush3.bf16.msra.mxu1 %v460_v12 }
  0x3b   :  { %435 = vmatprep.subr.bf16.mxu0 %v567_v1  ;;  %423 = vmatprep.subr.bf16.mxu1 %v567_v1 }
  0x3d   :  { %412 = vmatmul.mubr.msk.bf16.vlgmr.msra.gmra.mxu0 %vm113_vm1, %v73_v11 }
  0x3e   :  { %437 = vmatprep.mubr.msk.bf16.mxu0 %vm568_vm0, %v567_v1  ;;  %424 = vmatpush3.bf16.msra.mxu1 %v461_v13 }
  0x3f   :  { %425 = vmatprep.subr.bf16.mxu1 %v567_v1 }
  0x42   :  { %426 = vmatpush3.bf16.msra.mxu1 %v462_v14 }
  0x43   :  { %427 = vmatprep.subr.bf16.mxu1 %v567_v1 }
  0x46   :  { %428 = vmatpush3.bf16.msra.mxu1 %v463_v15 }
  0x47   :  { %429 = vmatprep.subr.bf16.mxu1 %v567_v1 }
  0x4a   :  { %430 = vmatpush3.bf16.msra.mxu1 %v464_v16 }
  0xaf   :  { %v286_v40 = vpop.permute.xlu0 %285 }
  0xfd   :  { %v151_v18 = vpop.f32.mrf.mxu0 }
  0xfe   :  { %v152_v20 = vadd.f32 %v368_v17, %v151_v18 }
  0xff   :  { %v413_v19 = vpop.f32.mrf.mxu0 }
 0x100   :  { %v158_v24 = vmax.f32 %v152_v20, 0.0 }
 0x101   :  { %v154_v21 = vpop.f32.mrf.mxu0 }
 0x102   :  { %v155_v22 = vadd.f32 %v368_v17, %v154_v21 }
 0x103   :  { %v414_v23 = vpop.f32.mrf.mxu0 }
 0x104   :  { %v159_v25 = vmax.f32 %v155_v22, 0.0 }
 0x106   :  { %v160_v26 = vpack.c.bf16 %v159_v25, %v158_v24 }
 0x108   :  { %432 = vmatmul.mubr.bf16.vlgmr.msra.gmra.mxu1 %v160_v26 }
 0x1c8   :  { %v266_v30 = vpop.f32.mrf.mxu1 }
 0x1c9   :  { %v267_v32 = vadd.f32 %v374_v29, %v266_v30 }
 0x1ca   :  { %v433_v31 = vpop.f32.mrf.mxu1 }
 0x1cb   :  { %v273_v36 = vmax.f32 %v267_v32, 0.0 }
 0x1cc   :  { %v269_v33 = vpop.f32.mrf.mxu1 }
 0x1cd   :  { %v270_v34 = vadd.f32 %v374_v29, %v269_v33 }
 0x1ce   :  { %v434_v35 = vpop.f32.mrf.mxu1 }
 0x1cf   :  { %v274_v37 = vmax.f32 %v270_v34, 0.0 }
 0x1d1   :  { %v275_v38 = vpack.c.bf16 %v274_v37, %v273_v36 }
 0x1d3   :  { %436 = vmatpush3.bf16.xpose.msra.mxu0 %v275_v38 }
 0x1da   :  { %438 = vmatmul.mubr.bf16.vlgmr.msra.gmra.mxu0 %v465_v39 }
 0x29a   :  { %v328_v41 = vpop.f32.mrf.mxu0 }
 0x29b   :  { %v329_v42 = vadd.f32 %v328_v41, %v286_v40 }
 0x29c   :  { %v439_v43 = vpop.f32.mrf.mxu0 }
 0x29d   :  { %v385_v44 = vmul.f32 -1.442695, %v329_v42 }
 0x29e   :  { %v331_v45 = vpop.f32.mrf.mxu0 }
 0x29f   :  { %466 = vpow2.f32 %v385_v44  ;;  %v332_v46 = vadd.f32 %v331_v45, %v286_v40 }
 0x2a0   :  { %v440_v47 = vpop.f32.mrf.mxu0 }
 0x2a1   :  { %v386_v48 = vmul.f32 -1.442695, %v332_v46 }
 0x2a3   :  { %468 = vpow2.f32 %v386_v48 }
 0x2ac   :  { %v467_v49 = vpop.eup %466 }
 0x2ad   :  { %v341_v50 = vadd.f32 1.0, %v467_v49 }
 0x2af   :  { %470 = vrcp.f32 %v341_v50 }
 0x2b0   :  { %v469_v51 = vpop.eup %468 }
 0x2b1   :  { %v342_v52 = vadd.f32 1.0, %v469_v51 }
 0x2b3   :  { %472 = vrcp.f32 %v342_v52 }
 0x2bc   :  { %v471_v53 = vpop.eup %470 }
 0x2bd   :  { %348 = vst.msk [vmem:[#allocation9] sm:$0xff] %vm347_vm2, %v471_v53 }
 0x2c0   :  { %v473_v54 = vpop.eup %472 }
 0x2c1   :  { %349 = vst.msk [vmem:[#allocation9 + $0x8] sm:$0xff] %vm347_vm2, %v473_v54 }
 0x2c2   :  { %545 = shalt.err (!%p542_p5)
}
 0x2c3   :  { %361 = dma.vmem_to_hbm [thread:$0]  %s356_s5, 256, %s651_s7, [#allocation5], %s564_s12, %s564_s12, %s565_s13  }
 0x2c4   :  { %558 = dma.done.wait [#allocation5], 256  }
 0x2c5   :  { %559 = vsyncadd [#allocation5], 4294967040 }
 0x2c6   :  { %365 = vsyncpa [#allocation4], 1 }
 0x2c7   :  { %366 = vsyncpa [#allocation7], 1 }
 0x2c8   :  { %367 = vsyncpa [#allocation5], 1 }

</bundles_post_ra>
